<compile_context>
chip_gen: v5e
topology: v5e:2x2
jax: 0.10.0
libtpu: 0.0.40
codegen_flags: <defaults>
</compile_context>

<pallas_src>
import jax
import jax.numpy as jnp
from jax.experimental import pallas as pl
from jax.experimental.pallas import tpu as pltpu

MAX_DEPTH = 5                       # depth=(1, 5) -> instantiate at max depth 5
ADD_TOTAL = sum(range(MAX_DEPTH))   # AddBlock(0..4) compose to a single +10
# TODO(synk): NNI's mutable depth choice (1..5) is a NAS search decision, not a
# tensor op; the kernel fixes the default/max depth of 5 blocks.


def repeat_add_kernel(x_ref, o_ref):
    """forward of 5 stacked AddBlocks, folded to one constant add."""
    o_ref[...] = x_ref[...] + jnp.asarray(ADD_TOTAL, x_ref.dtype)


def repeat_model_space_forward(x):
    """x: (N, C, H, W) array (PyTorch NCHW). Returns x passed through 5 AddBlocks."""
    orig_shape = x.shape
    dtype = x.dtype
    total = x.size

    # Pick the widest lane-dense width (multiple of 128) that divides the
    # element count exactly, so no padding copy is needed.
    lane = None
    for cand in (1024, 512, 256, 128):
        if total % cand == 0:
            lane = cand
            break

    if lane is None:
        # Rare fallback for element counts not divisible by 128: pad once.
        lane = 128
        rows = pl.cdiv(total, lane)
        pad = rows * lane - total
        flat = jnp.pad(x.reshape(-1), (0, pad))
    else:
        pad = 0
        rows = total // lane
        flat = x.reshape(-1)

    slab = flat.reshape(rows, lane)

    # Tile rows: 512 rows x `lane` lanes = at most 2 MiB per f32 buffer, so
    # input+output double-buffered stays well under every chip's scoped VMEM
    # default (16 MiB v5e, 32 MiB v6e/v7x). 512 is a multiple of 8 (f32) and
    # 16 (bf16 sublane packing). For small inputs use one full-extent block.
    tile_rows = rows if rows <= 512 else 512
    grid = (pl.cdiv(rows, tile_rows),)

    out_slab = pl.pallas_call(
        repeat_add_kernel,
        out_shape=jax.ShapeDtypeStruct((rows, lane), dtype),
        grid_spec=pltpu.PrefetchScalarGridSpec(
            num_scalar_prefetch=0,
            grid=grid,
            in_specs=[pl.BlockSpec((tile_rows, lane), lambda i: (i, 0))],
            out_specs=pl.BlockSpec((tile_rows, lane), lambda i: (i, 0)),
        ),
        compiler_params=pltpu.CompilerParams(
            # Elementwise + independent tiles -> shard across TCs on v7x.
            dimension_semantics=("parallel",),
        ),
    )(slab)

    out = out_slab.reshape(-1)
    if pad:
        out = out[:total]
    return out.reshape(orig_shape)


if __name__ == "__main__":
    key = jax.random.PRNGKey(0)
    x = jax.random.normal(key, (2, 4, 16, 16), dtype=jnp.float32)  # NCHW

    y = repeat_model_space_forward(x)
    y = jax.block_until_ready(y)

    # Reference: x + 0 + 1 + 2 + 3 + 4 = x + 10
    ref = x + float(ADD_TOTAL)
    assert y.shape == x.shape and y.dtype == x.dtype
    assert jnp.allclose(y, ref, atol=1e-6), "mismatch vs reference"

    print("KERNEL_OK")
</pallas_src>

<mosaic_0001>
module attributes {stable_mosaic.version = 11 : i64} {
  func.func @repeat_add_kernel(%arg0: i32, %arg1: memref<2x1024xf32, #tpu.memory_space<vmem>>, %arg2: memref<2x1024xf32, #tpu.memory_space<vmem>>) attributes {dimension_semantics = [#tpu.dimension_semantics<parallel>], iteration_bounds = array<i64: 1>, scalar_prefetch = 0 : i64, scratch_operands = 0 : i64, tpu.core_type = #tpu.core_type<tc>, window_params = [{transform_indices = @transform_0, window_bounds = array<i64: 2, 1024>}, {transform_indices = @transform_1, window_bounds = array<i64: 2, 1024>}]} {
    %c0 = arith.constant 0 : index
    %c0_0 = arith.constant 0 : index
    %0 = vector.load %arg1[%c0, %c0_0] : memref<2x1024xf32, #tpu.memory_space<vmem>>, vector<2x1024xf32>
    %cst = arith.constant 1.000000e+01 : f32
    %1 = vector.broadcast %cst : f32 to vector<2x1024xf32>
    %2 = arith.addf %0, %1 : vector<2x1024xf32>
    %c0_1 = arith.constant 0 : index
    %c0_2 = arith.constant 0 : index
    %3 = vector.load %arg2[%c0_1, %c0_2] : memref<2x1024xf32, #tpu.memory_space<vmem>>, vector<2x1024xf32>
    tpu.vector_store %arg2[%c0_1, %c0_2], %2 {strides = array<i32>} : memref<2x1024xf32, #tpu.memory_space<vmem>>, vector<2x1024xf32>,
    return
  }
  func.func @transform_0(%arg0: i32) -> (i32, i32) {
    %c0_i32 = arith.constant 0 : i32
    %c0_i32_0 = arith.constant 0 : i32
    return %arg0, %c0_i32 : i32, i32
  }
  func.func @transform_1(%arg0: i32) -> (i32, i32) {
    %c0_i32 = arith.constant 0 : i32
    %c0_i32_0 = arith.constant 0 : i32
    return %arg0, %c0_i32 : i32, i32
  }
}

</mosaic_0001>

<bundles_post_ra>
// kernel: tpu_custom_call.1
= control target key start
LH: loop header
LB: loop body
LE: loop exit
PB: predicated region body
PF: predicated region fallthrough
CT: control target
= control target key end

     0   :  { %6 = vsyncpa [#allocation3], 0  ;;  %s118_s0 = inlined_call_operand.hbm [shape: f32[2,1024], index: 0, kind: input, shape index: {}]   ;;  %s119_s1 = inlined_call_operand.hbm [shape: f32[2,1024], index: 1, kind: output, shape index: {}]  }
   0x1   :  { %7 = vsyncpa [#allocation4], 0  ;;  %s13_s8 = sshll.u32 %s118_s0, 4  ;;  %s100_s9 = smov [#allocation2]   ;;  %s14_s8 = int_to_ptr.hbm [resolvable:$true] %s13_s8 }
   0x2   :  { %s15_s10 = sshll.u32 %s100_s9, 4  ;;  %s16_s10 = int_to_ptr.vmem [resolvable:$true] %s15_s10 }
   0x3   :  { %18 = dma.hbm_to_vmem [thread:$0]  %s14_s8, 256, %s16_s10, [#allocation3]  }
   0x4   :  { %96 = dma.done.wait [#allocation3], 256  }
   0x5   :  { %97 = vsyncadd [#allocation3], 4294967040  ;;  %s101_s11 = smov [#allocation5]   ;;  %s36_s15 = sshll.u32 %s119_s1, 4  ;;  %v23_v0 = vld [vmem:[#allocation2] sm:$0xff]  ;;  %v24_v1 = vld [vmem:[#allocation2 + $0x8] sm:$0xff]  ;;  %s37_s15 = int_to_ptr.hbm [resolvable:$true] %s36_s15 }
   0x6   :  { %s34_s12 = sshll.u32 %s101_s11, 4  ;;  %v25_v2 = vadd.f32 10.0, %v23_v0  ;;  %v26_v3 = vadd.f32 10.0, %v24_v1  ;;  %s35_s12 = int_to_ptr.vmem [resolvable:$true] %s34_s12 }
   0x8   :  { %27 = vst [vmem:[#allocation5] sm:$0xff] %v25_v2 }
   0x9   :  { %28 = vst [vmem:[#allocation5 + $0x8] sm:$0xff] %v26_v3 }
   0xa   :  { %39 = dma.vmem_to_hbm [thread:$0]  %s35_s12, 256, %s37_s15, [#allocation4]  }
   0xb   :  { %98 = dma.done.wait [#allocation4], 256  }
   0xc   :  { %99 = vsyncadd [#allocation4], 4294967040 }
   0xd   :  { %44 = vsyncpa [#allocation3], 1 }
   0xe   :  { %45 = vsyncpa [#allocation4], 1 }

</bundles_post_ra>
